<compile_context>
chip_gen: v7x
topology: tpu7x:2x2x1
jax: 0.10.0
libtpu: 0.0.40
codegen_flags: <defaults>
</compile_context>

<pallas_src>
import math

import jax
import jax.numpy as jnp
from jax.experimental import pallas as pl
from jax.experimental.pallas import tpu as pltpu


# ----------------------------------------------------------------------------
# Glue: 1-D interpolation matrices matching torch.nn.functional.interpolate
# ----------------------------------------------------------------------------
def _interp_matrix(in_size: int, out_size: int, mode: str, align_corners: bool):
    """M of shape (out_size, in_size) s.t. y = M @ x reproduces PyTorch's 1-D
    interpolation along that axis."""
    o = jnp.arange(out_size, dtype=jnp.float32)

    if mode == "nearest":
        # PyTorch legacy 'nearest' (NOT 'nearest-exact'): src = floor(o*in/out)
        # TODO(synk): a gather-based path would avoid the one-hot matmul, but
        # the matmul path is exact and the op is HBM-bound anyway.
        idx = jnp.floor(o * (in_size / out_size)).astype(jnp.int32)
        idx = jnp.clip(idx, 0, in_size - 1)
        return jax.nn.one_hot(idx, in_size, dtype=jnp.float32)

    if mode != "bilinear":
        # TODO(synk): bicubic / area modes not implemented.
        raise NotImplementedError(mode)

    if align_corners:
        if out_size > 1 and in_size > 1:
            src = o * ((in_size - 1) / (out_size - 1))
        else:
            # PyTorch degenerate case (out_size == 1): scale = 0 -> index 0.
            src = jnp.zeros_like(o)
    else:
        scale = in_size / out_size
        src = (o + 0.5) * scale - 0.5
        src = jnp.maximum(src, 0.0)  # PyTorch clamps negative source coords

    i0 = jnp.floor(src).astype(jnp.int32)
    i0 = jnp.clip(i0, 0, in_size - 1)
    i1 = jnp.clip(i0 + 1, 0, in_size - 1)
    w1 = src - i0.astype(jnp.float32)
    w0 = 1.0 - w1
    M = (w0[:, None] * jax.nn.one_hot(i0, in_size, dtype=jnp.float32)
         + w1[:, None] * jax.nn.one_hot(i1, in_size, dtype=jnp.float32))
    return M


def _round_up(x: int, m: int) -> int:
    return ((x + m - 1) // m) * m


# ----------------------------------------------------------------------------
# Pallas kernel: one (TC, H, W) slab of channels -> (TC, H_out, W_out) slab
# ----------------------------------------------------------------------------
def _interp_kernel(x_ref, ah_ref, awt_ref, o_ref):
    tc, h_in, w_in = x_ref.shape           # (TC, H, W)
    h_out = ah_ref.shape[0]                # (H_out, H)
    w_out = awt_ref.shape[1]               # (W, W_out)

    x = x_ref[...]                         # (TC, H, W), input dtype

    # W-interp on the MXU (channel-batched):
    #   (TC, H, W) @ (TC, W, W_out) -> (TC, H, W_out), f32 accumulation.
    awt_b = jnp.broadcast_to(awt_ref[...], (tc, w_in, w_out))
    wm = jnp.einsum("chw,cwp->chp", x, awt_b,
                    preferred_element_type=jnp.float32)
    wm = wm.astype(ah_ref.dtype)

    # H-interp on the MXU (channel-batched):
    #   (TC, H_out, H) @ (TC, H, W_out) -> (TC, H_out, W_out).
    ah_b = jnp.broadcast_to(ah_ref[...], (tc, h_out, h_in))
    out = jnp.einsum("coh,chp->cop", ah_b, wm,
                     preferred_element_type=jnp.float32)

    # Output block is already in the natural (channel, H_out, W_out) layout.
    o_ref[...] = out.astype(o_ref.dtype)


# ----------------------------------------------------------------------------
# Wrapper
# ----------------------------------------------------------------------------
def interpolate(x, scale_factor, mode="bilinear", align_corners=False):
    """Pallas implementation of Interpolate.forward for NCHW input x."""
    N, C, H, W = x.shape
    H_out = int(math.floor(H * scale_factor))
    W_out = int(math.floor(W * scale_factor))

    A_h = _interp_matrix(H, H_out, mode, align_corners).astype(x.dtype)      # (H_out, H)
    A_w_T = _interp_matrix(W, W_out, mode, align_corners).T.astype(x.dtype)  # (W, W_out)

    B = N * C

    # --- choose channels-per-block (TC) against a conservative VMEM budget ---
    # Covers double-buffered in/out blocks, f32 intermediates and the
    # broadcast interpolation matrices, with slack.
    budget = 16 * 1024 * 1024
    bytes_per_chan = 4 * (3 * H * W + 2 * H * W_out + 4 * H_out * W_out
                          + H_out * H + W * W_out)
    tc_cap = int(max(1, min(budget // max(1, bytes_per_chan), B)))
    if B >= 16:
        # Prefer >= 2 grid steps when there is enough work (megacore / 2 TCs).
        tc_cap = max(1, min(tc_cap, B // 2))
    # Prefer a TC that divides B exactly (no channel-padding copy in the wrapper).
    tc = max(d for d in range(1, tc_cap + 1) if B % d == 0)
    if tc * 4 < tc_cap and B > 4 * tc_cap:
        # Pathological channel counts: pad channels instead of a very fine grid.
        tc = tc_cap
    B_pad = _round_up(B, tc)
    G = B_pad // tc
    # TODO(synk): very large planes (per-channel tiles exceeding VMEM) would
    # additionally need spatial tiling; not required for this module's shapes.

    # Free reshape to channel-major planes; pad channels only if TC forced it.
    x_flat = x.reshape(B, H, W)
    if B_pad != B:
        x_flat = jnp.pad(x_flat, ((0, B_pad - B), (0, 0), (0, 0)))

    out = pl.pallas_call(
        _interp_kernel,
        out_shape=jax.ShapeDtypeStruct((B_pad, H_out, W_out), x.dtype),
        grid_spec=pltpu.PrefetchScalarGridSpec(
            num_scalar_prefetch=0,
            grid=(G,),
            in_specs=[
                pl.BlockSpec((tc, H, W), lambda g: (g, 0, 0)),
                pl.BlockSpec((H_out, H), lambda g: (0, 0)),
                pl.BlockSpec((W, W_out), lambda g: (0, 0)),
            ],
            out_specs=pl.BlockSpec((tc, H_out, W_out), lambda g: (g, 0, 0)),
        ),
        compiler_params=pltpu.CompilerParams(
            dimension_semantics=("parallel",),
            vmem_limit_bytes=32 * 1024 * 1024,
        ),
    )(x_flat, A_h, A_w_T)

    # Natural layout already: (B_pad, H_out, W_out) -> (N, C, H_out, W_out).
    return out[:B].reshape(N, C, H_out, W_out)


# ----------------------------------------------------------------------------
# Pure-JAX reference (same coordinate math) for correctness check
# ----------------------------------------------------------------------------
def interpolate_ref(x, scale_factor, mode="bilinear", align_corners=False):
    N, C, H, W = x.shape
    H_out = int(math.floor(H * scale_factor))
    W_out = int(math.floor(W * scale_factor))
    A_h = _interp_matrix(H, H_out, mode, align_corners)
    A_w = _interp_matrix(W, W_out, mode, align_corners)
    return jnp.einsum("oh,nchw,pw->ncop", A_h, x.astype(jnp.float32), A_w
                      ).astype(x.dtype)


if __name__ == "__main__":
    key = jax.random.PRNGKey(0)
    # Small shapes consistent with the module's forward (NCHW conv-style input).
    N, C, H, W = 2, 4, 16, 16
    x = jax.random.normal(key, (N, C, H, W), dtype=jnp.float32)

    scale_factor = 2

    # bilinear (module default path)
    y = interpolate(x, scale_factor, mode="bilinear", align_corners=False)
    y = jax.block_until_ready(y)
    y_ref = interpolate_ref(x, scale_factor, mode="bilinear", align_corners=False)
    assert y.shape == (N, C, H * scale_factor, W * scale_factor), y.shape
    assert jnp.allclose(y, y_ref, atol=1e-5, rtol=1e-5), \
        float(jnp.max(jnp.abs(y - y_ref)))

    # bilinear, align_corners=True
    ya = interpolate(x, scale_factor, mode="bilinear", align_corners=True)
    ya = jax.block_until_ready(ya)
    ya_ref = interpolate_ref(x, scale_factor, mode="bilinear", align_corners=True)
    assert jnp.allclose(ya, ya_ref, atol=1e-5, rtol=1e-5), \
        float(jnp.max(jnp.abs(ya - ya_ref)))

    # nearest path
    yn = interpolate(x, scale_factor, mode="nearest", align_corners=False)
    yn = jax.block_until_ready(yn)
    yn_ref = interpolate_ref(x, scale_factor, mode="nearest", align_corners=False)
    assert jnp.allclose(yn, yn_ref, atol=1e-5, rtol=1e-5), \
        float(jnp.max(jnp.abs(yn - yn_ref)))

    # downscale path (scale_factor < 1)
    yd = interpolate(x, 0.5, mode="bilinear", align_corners=False)
    yd = jax.block_until_ready(yd)
    yd_ref = interpolate_ref(x, 0.5, mode="bilinear", align_corners=False)
    assert yd.shape == (N, C, H // 2, W // 2), yd.shape
    assert jnp.allclose(yd, yd_ref, atol=1e-5, rtol=1e-5), \
        float(jnp.max(jnp.abs(yd - yd_ref)))

    # bf16 path with a multi-step grid (B = 32 -> >= 2 grid steps)
    xb = jax.random.normal(key, (2, 16, 12, 20), dtype=jnp.bfloat16)
    yb = interpolate(xb, 2, mode="bilinear", align_corners=False)
    yb = jax.block_until_ready(yb)
    yb_ref = interpolate_ref(xb, 2, mode="bilinear", align_corners=False)
    assert yb.shape == (2, 16, 24, 40), yb.shape
    assert jnp.allclose(yb.astype(jnp.float32), yb_ref.astype(jnp.float32),
                        atol=5e-2, rtol=5e-2), \
        float(jnp.max(jnp.abs(yb.astype(jnp.float32) - yb_ref.astype(jnp.float32))))

    print("KERNEL_OK")
</pallas_src>

<mosaic_0001>
module attributes {stable_mosaic.version = 11 : i64} {
  func.func @_interp_kernel(%arg0: i32, %arg1: memref<8x16x16xf32, #tpu.memory_space<vmem>>, %arg2: memref<32x16xf32, #tpu.memory_space<vmem>>, %arg3: memref<16x32xf32, #tpu.memory_space<vmem>>, %arg4: memref<8x32x32xf32, #tpu.memory_space<vmem>>) attributes {dimension_semantics = [#tpu.dimension_semantics<parallel>], iteration_bounds = array<i64: 1>, scalar_prefetch = 0 : i64, scratch_operands = 0 : i64, tpu.core_type = #tpu.core_type<tc>, window_params = [{transform_indices = @transform_0, window_bounds = array<i64: 8, 16, 16>}, {pipeline_mode = #tpu.pipeline_mode<synchronous>, transform_indices = @transform_1, window_bounds = array<i64: 32, 16>}, {pipeline_mode = #tpu.pipeline_mode<synchronous>, transform_indices = @transform_2, window_bounds = array<i64: 16, 32>}, {transform_indices = @transform_3, window_bounds = array<i64: 8, 32, 32>}]} {
    %c0 = arith.constant 0 : index
    %c0_0 = arith.constant 0 : index
    %c0_1 = arith.constant 0 : index
    %0 = vector.load %arg1[%c0, %c0_0, %c0_1] : memref<8x16x16xf32, #tpu.memory_space<vmem>>, vector<8x16x16xf32>
    %c0_2 = arith.constant 0 : index
    %c0_3 = arith.constant 0 : index
    %1 = vector.load %arg3[%c0_2, %c0_3] : memref<16x32xf32, #tpu.memory_space<vmem>>, vector<16x32xf32>
    %2 = vector.shape_cast %1 : vector<16x32xf32> to vector<1x16x32xf32>
    %3 = vector.broadcast %2 : vector<1x16x32xf32> to vector<8x16x32xf32>
    "tpu.trace_start"() <{level = 10 : i32, message = "chw,cwp->chp"}> : () -> ()
    %cst = arith.constant dense<0.000000e+00> : vector<8x16x32xf32>
    %4 = tpu.matmul %0, %3, %cst {dimension_numbers = #tpu.dot_dimension_numbers<[2], [1], [1], [2], [0, 0, 0, 1, 1, 2], [0], [0]>} : vector<8x16x16xf32>, vector<8x16x32xf32>, vector<8x16x32xf32> -> vector<8x16x32xf32>
    "tpu.trace_stop"() : () -> ()
    %c0_4 = arith.constant 0 : index
    %c0_5 = arith.constant 0 : index
    %5 = vector.load %arg2[%c0_4, %c0_5] : memref<32x16xf32, #tpu.memory_space<vmem>>, vector<32x16xf32>
    %6 = vector.shape_cast %5 : vector<32x16xf32> to vector<1x32x16xf32>
    %7 = vector.broadcast %6 : vector<1x32x16xf32> to vector<8x32x16xf32>
    "tpu.trace_start"() <{level = 10 : i32, message = "coh,chp->cop"}> : () -> ()
    %cst_6 = arith.constant dense<0.000000e+00> : vector<8x32x32xf32>
    %8 = tpu.matmul %7, %4, %cst_6 {dimension_numbers = #tpu.dot_dimension_numbers<[2], [1], [1], [2], [0, 0, 0, 1, 1, 2], [0], [0]>} : vector<8x32x16xf32>, vector<8x16x32xf32>, vector<8x32x32xf32> -> vector<8x32x32xf32>
    "tpu.trace_stop"() : () -> ()
    %c0_7 = arith.constant 0 : index
    %c0_8 = arith.constant 0 : index
    %c0_9 = arith.constant 0 : index
    %9 = vector.load %arg4[%c0_7, %c0_8, %c0_9] : memref<8x32x32xf32, #tpu.memory_space<vmem>>, vector<8x32x32xf32>
    tpu.vector_store %arg4[%c0_7, %c0_8, %c0_9], %8 {strides = array<i32>} : memref<8x32x32xf32, #tpu.memory_space<vmem>>, vector<8x32x32xf32>,
    return
  }
  func.func @transform_0(%arg0: i32) -> (i32, i32, i32) {
    %c0_i32 = arith.constant 0 : i32
    %c0_i32_0 = arith.constant 0 : i32
    %c0_i32_1 = arith.constant 0 : i32
    return %arg0, %c0_i32, %c0_i32_0 : i32, i32, i32
  }
  func.func @transform_1(%arg0: i32) -> (i32, i32) {
    %c0_i32 = arith.constant 0 : i32
    %c0_i32_0 = arith.constant 0 : i32
    %c0_i32_1 = arith.constant 0 : i32
    return %c0_i32, %c0_i32_0 : i32, i32
  }
  func.func @transform_2(%arg0: i32) -> (i32, i32) {
    %c0_i32 = arith.constant 0 : i32
    %c0_i32_0 = arith.constant 0 : i32
    %c0_i32_1 = arith.constant 0 : i32
    return %c0_i32, %c0_i32_0 : i32, i32
  }
  func.func @transform_3(%arg0: i32) -> (i32, i32, i32) {
    %c0_i32 = arith.constant 0 : i32
    %c0_i32_0 = arith.constant 0 : i32
    %c0_i32_1 = arith.constant 0 : i32
    return %arg0, %c0_i32, %c0_i32_0 : i32, i32, i32
  }
}

</mosaic_0001>

<bundles_post_ra>
// kernel: tpu_custom_call.1
= control target key start
LH: loop header
LB: loop body
LE: loop exit
PB: predicated region body
PF: predicated region fallthrough
CT: control target
= control target key end

     0   :  { %8 = vsyncpa [#allocation3], 0  ;;  %s1984_s0 = inlined_call_operand.hbm [shape: f32[8,16,16], index: 0, kind: input, shape index: {}]   ;;  %s1985_s1 = inlined_call_operand.vmem [shape: f32[32,16], index: 1, kind: input, shape index: {}]   ;;  %s1986_s2 = inlined_call_operand.vmem [shape: f32[16,32], index: 2, kind: input, shape index: {}]   ;;  %s1987_s3 = inlined_call_operand.hbm [shape: f32[8,32,32], index: 3, kind: output, shape index: {}]  }
   0x1   :  { %9 = vsyncpa [#allocation4], 0  ;;  %s1822_s12 = smov [#allocation2]   ;;  %s1774_s16 = scalar_lea.hbm %s1984_s0, 2048 }
   0x2   :  { %s15_s13 = sshll.u32 %s1822_s12, 4  ;;  %p1775_p0 = scmp.ne.s32.totalorder %s1984_s0, %s1774_s16  ;;  %s16_s13 = int_to_ptr.vmem [resolvable:$true] %s15_s13 }
   0x3   :  { %p1778_p1 = scmp.lt.u32.totalorder %s1774_s16, %s1984_s0 }
   0x5   :  { %p1780_p2 = pnand %p1778_p1, %p1775_p0 }
   0x7   :  { %1783 = shalt.err (!%p1780_p2)
}
   0x8   :  { %s1784_s21 = scalar_lea.vmem %s16_s13, 2048  ;;  %p1789_p4 = scmp.lt.s32.totalorder %s16_s13, %s16_s13 }
   0x9   :  { %p1785_p3 = scmp.ne.s32.totalorder %s16_s13, %s1784_s21  ;;  %p1790_p5 = scmp.lt.s32.totalorder %s1784_s21, %s1784_s21 }
   0xb   :  { %p1791_p6 = por %p1790_p5, %p1789_p4 }
   0xd   :  { %p1792_p7 = pnand %p1791_p6, %p1785_p3 }
   0xf   :  { %1795 = shalt.err (!%p1792_p7)
}
  0x10   :  { %s1823_s22 = smov 128   ;;  %s1824_s23 = smov 8  }
  0x11   :  { %21 = dma.hbm_to_vmem [thread:$0]  %s1984_s0, 2048, %s16_s13, [#allocation3], %s1823_s22, %s1823_s22, %s1824_s23  }
  0x12   :  { %1818 = dma.done.wait [#allocation3], 2048  }
  0x13   :  { %1819 = vsyncadd [#allocation3], 4294965248  ;;  %vm47_vm0 = vcmask 130048   ;;  %v45_v0 = vld [vmem:[%s1986_s2] sm:$0xff]  ;;  %v46_v1 = vld [vmem:[%s1986_s2 + $0x8] sm:$0xff]  ;;  %vm1392_vm1 = vcmask 261120  }
  0x14   :  { %v29_v2 = vld [vmem:[#allocation2] sm:$0xff]  ;;  %v1706_v3 = vpack.c.bf16 %v46_v1, %v45_v0  ;;  %v31_v4 = vld [vmem:[#allocation2 + $0x10] sm:$0xff]  ;;  %v30_v5 = vld [vmem:[#allocation2 + $0x8] sm:$0xff] }
  0x15   :  { %1574 = vmatprep.mubr.msk.f32.mxu0 %vm47_vm0, %v29_v2  ;;  %1581 = vmatprep.mubr.msk.f32.mxu1 %vm47_vm0, %v31_v4  ;;  %v32_v6 = vld [vmem:[#allocation2 + $0x18] sm:$0xff]  ;;  %v33_v7 = vld [vmem:[#allocation2 + $0x20] sm:$0xff]  ;;  %v35_v8 = vld [vmem:[#allocation2 + $0x30] sm:$0xff] }
  0x16   :  { %1707 = vmatprep.subr.bf16.mxu0 %v1706_v3  ;;  %1711 = vmatprep.subr.bf16.mxu1 %v1706_v3  ;;  %v34_v9 = vld [vmem:[#allocation2 + $0x28] sm:$0xff]  ;;  %v36_v10 = vld [vmem:[#allocation2 + $0x38] sm:$0xff]  ;;  %v37_v11 = vld [vmem:[#allocation2 + $0x40] sm:$0xff] }
  0x17   :  { %1709 = vmatpush3.bf16.msra.mxu0 %v1706_v3  ;;  %1713 = vmatpush3.bf16.msra.mxu1 %v1706_v3  ;;  %v39_v12 = vld [vmem:[#allocation2 + $0x50] sm:$0xff]  ;;  %v38_v13 = vld [vmem:[#allocation2 + $0x48] sm:$0xff]  ;;  %v40_v14 = vld [vmem:[#allocation2 + $0x58] sm:$0xff] }
  0x18   :  { %1715 = vmatprep.subr.bf16.mxu0 %v1706_v3  ;;  %1719 = vmatprep.subr.bf16.mxu1 %v1706_v3  ;;  %v41_v15 = vld [vmem:[#allocation2 + $0x60] sm:$0xff]  ;;  %v43_v16 = vld [vmem:[#allocation2 + $0x70] sm:$0xff]  ;;  %v42_v17 = vld [vmem:[#allocation2 + $0x68] sm:$0xff] }
  0x19   :  { %v44_v18 = vld [vmem:[#allocation2 + $0x78] sm:$0xff]  ;;  %v1886_v19 = vld [vmem:[%s1985_s1] sm:$0xff]  ;;  %v697_v30 = vld [vmem:[%s1985_s1 + $0x8] sm:$0xff] }
  0x1a   :  { %1575 = vmatmul.mubr.msk.f32.vlgmr.msra.gmra.mrb[0].mxu0 %vm47_vm0, %v30_v5  ;;  %1582 = vmatmul.mubr.msk.f32.vlgmr.msra.gmra.mrb[0].mxu1 %vm47_vm0, %v32_v6  ;;  %v698_v35 = vld [vmem:[%s1985_s1 + $0x10] sm:$0xff]  ;;  %v699_v38 = vld [vmem:[%s1985_s1 + $0x18] sm:$0xff]  ;;  %s1825_s1 = smov [#allocation5]  }
  0x1b   :  { %1717 = vmatpush3.bf16.msra.mxu0 %v1706_v3  ;;  %1721 = vmatpush3.bf16.msra.mxu1 %v1706_v3  ;;  %s1430_s9 = sshll.u32 %s1825_s1, 4  ;;  %s1431_s9 = int_to_ptr.vmem [resolvable:$true] %s1430_s9 }
  0x1c   :  { %1588 = vmatprep.mubr.msk.f32.mxu0 %vm47_vm0, %v33_v7  ;;  %1595 = vmatprep.mubr.msk.f32.mxu1 %vm47_vm0, %v35_v8  ;;  %s1796_s10 = scalar_lea.vmem %s1431_s9, 4096  ;;  %p1801_p9 = scmp.lt.s32.totalorder %s1431_s9, %s1431_s9 }
  0x1d   :  { %1723 = vmatprep.subr.bf16.mxu0 %v1706_v3  ;;  %1727 = vmatprep.subr.bf16.mxu1 %v1706_v3  ;;  %p1797_p8 = scmp.ne.s32.totalorder %s1431_s9, %s1796_s10  ;;  %p1802_p10 = scmp.lt.s32.totalorder %s1796_s10, %s1796_s10 }
  0x1e   :  { %1589 = vmatmul.mubr.msk.f32.vlgmr.msra.gmra.mrb[2].mxu0 %vm47_vm0, %v34_v9  ;;  %1596 = vmatmul.mubr.msk.f32.vlgmr.msra.gmra.mrb[2].mxu1 %vm47_vm0, %v36_v10 }
  0x1f   :  { %1725 = vmatpush3.bf16.msra.mxu0 %v1706_v3  ;;  %1729 = vmatpush3.bf16.msra.mxu1 %v1706_v3  ;;  %p1803_p11 = por %p1802_p10, %p1801_p9 }
  0x20   :  { %1602 = vmatprep.mubr.msk.f32.mxu0 %vm47_vm0, %v37_v11  ;;  %1609 = vmatprep.mubr.msk.f32.mxu1 %vm47_vm0, %v39_v12 }
  0x21   :  { %1731 = vmatprep.subr.bf16.mxu0 %v1706_v3  ;;  %1735 = vmatprep.subr.bf16.mxu1 %v1706_v3  ;;  %p1804_p12 = pnand %p1803_p11, %p1797_p8 }
  0x22   :  { %1603 = vmatmul.mubr.msk.f32.vlgmr.msra.gmra.mrb[4].mxu0 %vm47_vm0, %v38_v13  ;;  %1610 = vmatmul.mubr.msk.f32.vlgmr.msra.gmra.mrb[4].mxu1 %vm47_vm0, %v40_v14 }
  0x23   :  { %1733 = vmatpush3.bf16.msra.mxu0 %v1706_v3  ;;  %1737 = vmatpush3.bf16.msra.mxu1 %v1706_v3 }
  0x24   :  { %1616 = vmatprep.mubr.msk.f32.mxu0 %vm47_vm0, %v41_v15  ;;  %1623 = vmatprep.mubr.msk.f32.mxu1 %vm47_vm0, %v43_v16 }
  0x26   :  { %1617 = vmatmul.mubr.msk.f32.vlgmr.msra.gmra.mrb[6].mxu0 %vm47_vm0, %v42_v17  ;;  %1624 = vmatmul.mubr.msk.f32.vlgmr.msra.gmra.mrb[6].mxu1 %vm47_vm0, %v44_v18 }
  0x27   :  { %1630 = vmatprep.mubr.msk.f32.mxu0 %vm47_vm0, %v1886_v19  ;;  %1640 = vmatprep.mubr.msk.f32.mxu1 %vm47_vm0, %v1886_v19 }
  0xed   :  { %v1576_v20 = vpop.f32.mrb[0].mxu0  ;;  %v1583_v21 = vpop.f32.mrb[0].mxu1 }
  0xee   :  { %v120_v22 = vpop.f32.mrb[1].mxu0  ;;  %v201_v23 = vpop.f32.mrb[1].mxu1 }
  0xef   :  { %v1738_v24 = vpack.c.bf16 %v1576_v20, %v120_v22  ;;  %v1742_v25 = vpack.c.bf16 %v1583_v21, %v201_v23 }
  0xf1   :  { %v1590_v26 = vpop.f32.mrb[2].mxu0  ;;  %v1597_v27 = vpop.f32.mrb[2].mxu1  ;;  %1739 = vmatprep.subr.bf16.mxu0 %v1738_v24  ;;  %1743 = vmatprep.subr.bf16.mxu1 %v1742_v25 }
  0xf2   :  { %v282_v28 = vpop.f32.mrb[3].mxu0  ;;  %v363_v29 = vpop.f32.mrb[3].mxu1  ;;  %1741 = vmatpush3.bf16.msra.mxu0 %v1738_v24  ;;  %1745 = vmatpush3.bf16.msra.mxu1 %v1742_v25 }
  0xf3   :  { %v1746_v31 = vpack.c.bf16 %v1590_v26, %v282_v28  ;;  %v1750_v32 = vpack.c.bf16 %v1597_v27, %v363_v29 }
  0xf5   :  { %1631 = vmatmul.mubr.msk.f32.vlgmr.msra.gmra.mrb[8].mxu0 %vm47_vm0, %v697_v30  ;;  %1641 = vmatmul.mubr.msk.f32.vlgmr.msra.gmra.mrb[8].mxu1 %vm47_vm0, %v697_v30  ;;  %v1604_v33 = vpop.f32.mrb[4].mxu0  ;;  %v1611_v34 = vpop.f32.mrb[4].mxu1 }
  0xf6   :  { %1747 = vmatprep.subr.bf16.mxu0 %v1746_v31  ;;  %1751 = vmatprep.subr.bf16.mxu1 %v1750_v32  ;;  %v444_v36 = vpop.f32.mrb[5].mxu0  ;;  %v525_v37 = vpop.f32.mrb[5].mxu1 }
  0xf7   :  { %1749 = vmatpush3.bf16.msra.mxu0 %v1746_v31  ;;  %1753 = vmatpush3.bf16.msra.mxu1 %v1750_v32  ;;  %v1754_v39 = vpack.c.bf16 %v1604_v33, %v444_v36  ;;  %v1758_v40 = vpack.c.bf16 %v1611_v34, %v525_v37 }
  0xf8   :  { %1633 = vmatprep.mubr.msk.f32.mxu0 %vm47_vm0, %v698_v35  ;;  %1643 = vmatprep.mubr.msk.f32.mxu1 %vm47_vm0, %v698_v35 }
  0xf9   :  { %1634 = vmatmul.mubr.msk.f32.gmra.mrb[10].mxu0 %vm47_vm0, %v699_v38  ;;  %1644 = vmatmul.mubr.msk.f32.gmra.mrb[10].mxu1 %vm47_vm0, %v699_v38  ;;  %v1618_v41 = vpop.f32.mrb[6].mxu0  ;;  %v1625_v42 = vpop.f32.mrb[6].mxu1 }
  0xfa   :  { %1650 = vmatprep.mubr.msk.f32.mxu0 %vm47_vm0, %v1886_v19  ;;  %1660 = vmatprep.mubr.msk.f32.mxu1 %vm47_vm0, %v1886_v19  ;;  %v606_v43 = vpop.f32.mrb[7].mxu0  ;;  %v687_v44 = vpop.f32.mrb[7].mxu1 }
  0xfb   :  { %1755 = vmatprep.subr.bf16.mxu0 %v1754_v39  ;;  %1759 = vmatprep.subr.bf16.mxu1 %v1758_v40  ;;  %v1762_v45 = vpack.c.bf16 %v1618_v41, %v606_v43  ;;  %v1766_v46 = vpack.c.bf16 %v1625_v42, %v687_v44 }
  0xfd   :  { %1651 = vmatmul.mubr.msk.f32.vlgmr.msra.gmra.mrb[12].mxu0 %vm47_vm0, %v697_v30  ;;  %1661 = vmatmul.mubr.msk.f32.vlgmr.msra.gmra.mrb[12].mxu1 %vm47_vm0, %v697_v30 }
  0xfe   :  { %1757 = vmatpush3.bf16.msra.mxu0 %v1754_v39  ;;  %1761 = vmatpush3.bf16.msra.mxu1 %v1758_v40 }
  0xff   :  { %1653 = vmatprep.mubr.msk.f32.mxu0 %vm47_vm0, %v698_v35  ;;  %1663 = vmatprep.mubr.msk.f32.mxu1 %vm47_vm0, %v698_v35 }
 0x100   :  { %1763 = vmatprep.subr.bf16.mxu0 %v1762_v45  ;;  %1767 = vmatprep.subr.bf16.mxu1 %v1766_v46 }
 0x101   :  { %1654 = vmatmul.mubr.msk.f32.gmra.mrb[14].mxu0 %vm47_vm0, %v699_v38  ;;  %1664 = vmatmul.mubr.msk.f32.gmra.mrb[14].mxu1 %vm47_vm0, %v699_v38 }
 0x102   :  { %1670 = vmatprep.mubr.msk.f32.mxu0 %vm47_vm0, %v1886_v19  ;;  %1680 = vmatprep.mubr.msk.f32.mxu1 %vm47_vm0, %v1886_v19 }
 0x105   :  { %1671 = vmatmul.mubr.msk.f32.vlgmr.msra.gmra.mrb[16].mxu0 %vm47_vm0, %v697_v30  ;;  %1681 = vmatmul.mubr.msk.f32.vlgmr.msra.gmra.mrb[16].mxu1 %vm47_vm0, %v697_v30 }
 0x106   :  { %1765 = vmatpush3.bf16.msra.mxu0 %v1762_v45  ;;  %1769 = vmatpush3.bf16.msra.mxu1 %v1766_v46 }
 0x107   :  { %1673 = vmatprep.mubr.msk.f32.mxu0 %vm47_vm0, %v698_v35  ;;  %1683 = vmatprep.mubr.msk.f32.mxu1 %vm47_vm0, %v698_v35 }
 0x109   :  { %1674 = vmatmul.mubr.msk.f32.gmra.mrb[18].mxu0 %vm47_vm0, %v699_v38  ;;  %1684 = vmatmul.mubr.msk.f32.gmra.mrb[18].mxu1 %vm47_vm0, %v699_v38 }
 0x10a   :  { %1690 = vmatprep.mubr.msk.f32.mxu0 %vm47_vm0, %v1886_v19  ;;  %1700 = vmatprep.mubr.msk.f32.mxu1 %vm47_vm0, %v1886_v19 }
 0x10d   :  { %1691 = vmatmul.mubr.msk.f32.vlgmr.msra.gmra.mrb[20].mxu0 %vm47_vm0, %v697_v30  ;;  %1701 = vmatmul.mubr.msk.f32.vlgmr.msra.gmra.mrb[20].mxu1 %vm47_vm0, %v697_v30 }
 0x10e   :  { %1693 = vmatprep.mubr.msk.f32.mxu0 %vm47_vm0, %v698_v35  ;;  %1703 = vmatprep.mubr.msk.f32.mxu1 %vm47_vm0, %v698_v35 }
 0x111   :  { %1694 = vmatmul.mubr.msk.f32.gmra.mrb[22].mxu0 %vm47_vm0, %v699_v38  ;;  %1704 = vmatmul.mubr.msk.f32.gmra.mrb[22].mxu1 %vm47_vm0, %v699_v38 }
 0x1c8   :  { %v1632_v47 = vpop.f32.mrb[8].mxu0  ;;  %v1642_v48 = vpop.f32.mrb[8].mxu1 }
 0x1c9   :  { %1394 = vst.msk [vmem:[#allocation5 + $0x8] sm:$0xff] %vm1392_vm1, %v1632_v47  ;;  %1398 = vst.msk [vmem:[#allocation5 + $0x28] sm:$0xff] %vm1392_vm1, %v1642_v48  ;;  %v778_v49 = vpop.f32.mrb[9].mxu0  ;;  %v863_v50 = vpop.f32.mrb[9].mxu1 }
 0x1ca   :  { %1393 = vst.msk [vmem:[#allocation5] sm:$0xff] %vm1392_vm1, %v778_v49  ;;  %1397 = vst.msk [vmem:[#allocation5 + $0x20] sm:$0xff] %vm1392_vm1, %v863_v50 }
 0x1cc   :  { %v1635_v51 = vpop.f32.mrb[10].mxu0  ;;  %v1645_v52 = vpop.f32.mrb[10].mxu1 }
 0x1cd   :  { %1396 = vst.msk [vmem:[#allocation5 + $0x18] sm:$0xff] %vm1392_vm1, %v1635_v51  ;;  %1400 = vst.msk [vmem:[#allocation5 + $0x38] sm:$0xff] %vm1392_vm1, %v1645_v52  ;;  %v788_v53 = vpop.f32.mrb[11].mxu0  ;;  %v873_v54 = vpop.f32.mrb[11].mxu1 }
 0x1ce   :  { %1395 = vst.msk [vmem:[#allocation5 + $0x10] sm:$0xff] %vm1392_vm1, %v788_v53  ;;  %1399 = vst.msk [vmem:[#allocation5 + $0x30] sm:$0xff] %vm1392_vm1, %v873_v54 }
 0x1d0   :  { %v1652_v55 = vpop.f32.mrb[12].mxu0  ;;  %v1662_v56 = vpop.f32.mrb[12].mxu1 }
 0x1d1   :  { %1402 = vst.msk [vmem:[#allocation5 + $0x48] sm:$0xff] %vm1392_vm1, %v1652_v55  ;;  %1406 = vst.msk [vmem:[#allocation5 + $0x68] sm:$0xff] %vm1392_vm1, %v1662_v56  ;;  %v948_v57 = vpop.f32.mrb[13].mxu0  ;;  %v1033_v58 = vpop.f32.mrb[13].mxu1 }
 0x1d2   :  { %1401 = vst.msk [vmem:[#allocation5 + $0x40] sm:$0xff] %vm1392_vm1, %v948_v57  ;;  %1405 = vst.msk [vmem:[#allocation5 + $0x60] sm:$0xff] %vm1392_vm1, %v1033_v58 }
 0x1d4   :  { %v1655_v59 = vpop.f32.mrb[14].mxu0  ;;  %v1665_v60 = vpop.f32.mrb[14].mxu1 }
 0x1d5   :  { %1404 = vst.msk [vmem:[#allocation5 + $0x58] sm:$0xff] %vm1392_vm1, %v1655_v59  ;;  %1408 = vst.msk [vmem:[#allocation5 + $0x78] sm:$0xff] %vm1392_vm1, %v1665_v60  ;;  %v958_v61 = vpop.f32.mrb[15].mxu0  ;;  %v1043_v62 = vpop.f32.mrb[15].mxu1 }
 0x1d6   :  { %1403 = vst.msk [vmem:[#allocation5 + $0x50] sm:$0xff] %vm1392_vm1, %v958_v61  ;;  %1407 = vst.msk [vmem:[#allocation5 + $0x70] sm:$0xff] %vm1392_vm1, %v1043_v62 }
 0x1d8   :  { %v1672_v63 = vpop.f32.mrb[16].mxu0  ;;  %v1682_v0 = vpop.f32.mrb[16].mxu1 }
 0x1d9   :  { %1410 = vst.msk [vmem:[#allocation5 + $0x88] sm:$0xff] %vm1392_vm1, %v1672_v63  ;;  %1414 = vst.msk [vmem:[#allocation5 + $0xa8] sm:$0xff] %vm1392_vm1, %v1682_v0  ;;  %v1118_v1 = vpop.f32.mrb[17].mxu0  ;;  %v1203_v2 = vpop.f32.mrb[17].mxu1 }
 0x1da   :  { %1409 = vst.msk [vmem:[#allocation5 + $0x80] sm:$0xff] %vm1392_vm1, %v1118_v1  ;;  %1413 = vst.msk [vmem:[#allocation5 + $0xa0] sm:$0xff] %vm1392_vm1, %v1203_v2 }
 0x1dc   :  { %v1675_v3 = vpop.f32.mrb[18].mxu0  ;;  %v1685_v4 = vpop.f32.mrb[18].mxu1 }
 0x1dd   :  { %1412 = vst.msk [vmem:[#allocation5 + $0x98] sm:$0xff] %vm1392_vm1, %v1675_v3  ;;  %1416 = vst.msk [vmem:[#allocation5 + $0xb8] sm:$0xff] %vm1392_vm1, %v1685_v4  ;;  %v1128_v5 = vpop.f32.mrb[19].mxu0  ;;  %v1213_v6 = vpop.f32.mrb[19].mxu1 }
 0x1de   :  { %1411 = vst.msk [vmem:[#allocation5 + $0x90] sm:$0xff] %vm1392_vm1, %v1128_v5  ;;  %1415 = vst.msk [vmem:[#allocation5 + $0xb0] sm:$0xff] %vm1392_vm1, %v1213_v6 }
 0x1e0   :  { %v1692_v7 = vpop.f32.mrb[20].mxu0  ;;  %v1702_v8 = vpop.f32.mrb[20].mxu1 }
 0x1e1   :  { %1418 = vst.msk [vmem:[#allocation5 + $0xc8] sm:$0xff] %vm1392_vm1, %v1692_v7  ;;  %1422 = vst.msk [vmem:[#allocation5 + $0xe8] sm:$0xff] %vm1392_vm1, %v1702_v8  ;;  %v1288_v9 = vpop.f32.mrb[21].mxu0  ;;  %v1373_v10 = vpop.f32.mrb[21].mxu1 }
 0x1e2   :  { %1417 = vst.msk [vmem:[#allocation5 + $0xc0] sm:$0xff] %vm1392_vm1, %v1288_v9  ;;  %1421 = vst.msk [vmem:[#allocation5 + $0xe0] sm:$0xff] %vm1392_vm1, %v1373_v10 }
 0x1e4   :  { %v1695_v11 = vpop.f32.mrb[22].mxu0  ;;  %v1705_v12 = vpop.f32.mrb[22].mxu1 }
 0x1e5   :  { %1420 = vst.msk [vmem:[#allocation5 + $0xd8] sm:$0xff] %vm1392_vm1, %v1695_v11  ;;  %1424 = vst.msk [vmem:[#allocation5 + $0xf8] sm:$0xff] %vm1392_vm1, %v1705_v12  ;;  %v1298_v13 = vpop.f32.mrb[23].mxu0  ;;  %v1383_v14 = vpop.f32.mrb[23].mxu1 }
 0x1e6   :  { %1419 = vst.msk [vmem:[#allocation5 + $0xd0] sm:$0xff] %vm1392_vm1, %v1298_v13  ;;  %1423 = vst.msk [vmem:[#allocation5 + $0xf0] sm:$0xff] %vm1392_vm1, %v1383_v14 }
 0x1e7   :  { %1807 = shalt.err (!%p1804_p12)
}
 0x1e8   :  { %s1808_s13 = scalar_lea.hbm %s1987_s3, 4096 }
 0x1e9   :  { %p1809_p13 = scmp.ne.s32.totalorder %s1987_s3, %s1808_s13  ;;  %p1812_p0 = scmp.lt.u32.totalorder %s1808_s13, %s1987_s3 }
 0x1eb   :  { %p1814_p1 = pnand %p1812_p0, %p1809_p13 }
 0x1ed   :  { %1817 = shalt.err (!%p1814_p1)
}
 0x1ee   :  { %1436 = dma.vmem_to_hbm [thread:$0]  %s1431_s9, 4096, %s1987_s3, [#allocation4], %s1823_s22, %s1823_s22, %s1824_s23  }
 0x1ef   :  { %1820 = dma.done.wait [#allocation4], 4096  }
 0x1f0   :  { %1821 = vsyncadd [#allocation4], 4294963200 }
 0x1f1   :  { %1440 = vsyncpa [#allocation3], 1 }
 0x1f2   :  { %1441 = vsyncpa [#allocation4], 1 }

</bundles_post_ra>
